<compile_context>
chip_gen: v6e
topology: v6e:2x2x1
jax: 0.10.0
libtpu: 0.0.40
codegen_flags: <defaults>
</compile_context>

<pallas_src>
import jax
import jax.numpy as jnp
from jax import lax
from jax.experimental import pallas as pl
from jax.experimental.pallas import tpu as pltpu


def _round_up(n, m):
    return ((n + m - 1) // m) * m


def _pad_to(a, target_shape):
    pads = [(0, t - s) for s, t in zip(a.shape, target_shape)]
    if all(p == (0, 0) for p in pads):
        return a
    return jnp.pad(a, pads)


# ---------------------------------------------------------------------------
# Fused kernel: input2h (block matmul) -> sequential CTRNN -> fc (block matmul)
# Grid: (batch_blocks [parallel], time_blocks [arbitrary / sequential]).
# ---------------------------------------------------------------------------
def _make_rnn_kernel(alpha, matmul_dtype):
    def kernel(x_ref, w_in_ref, b_pre_ref, w_hh_ref, w_fc_ref, b_fc_ref,
               rnn_ref, out_ref, h_scratch, pre_scratch):
        # Reset the carried hidden state at the start of each batch block's
        # time sweep (CTRNN.init_hidden -> zeros).
        @pl.when(pl.program_id(1) == 0)
        def _():
            h_scratch[...] = jnp.zeros_like(h_scratch)

        tb, bb, ip = x_ref.shape
        hp = w_hh_ref.shape[0]

        # (1) Fused input projection for the whole time block: one lane-dense
        #     (tb*bb, Ip) @ (Ip, Hp) MXU matmul; b_in + b_hh already folded.
        pre_scratch[...] = (
            jnp.dot(x_ref[...].reshape(tb * bb, ip), w_in_ref[...],
                    preferred_element_type=jnp.float32)
            + b_pre_ref[...]
        ).reshape(tb, bb, hp)

        w_hh = w_hh_ref[...]  # loop-invariant; loaded once per grid step

        # (2) Sequential CTRNN recurrence (latency-bound serial chain).
        def step(i, h):
            hh = jnp.dot(h.astype(matmul_dtype), w_hh,
                         preferred_element_type=jnp.float32)
            h_new = jnp.maximum(pre_scratch[i] + hh, 0.0)   # relu, f32
            if alpha == 1.0:
                # dt=None specialization: leaky mix is the identity.
                h = h_new
            else:
                h = h * (1.0 - alpha) + h_new * alpha       # leaky CT update, f32
            rnn_ref[i] = h.astype(rnn_ref.dtype)
            return h

        h_scratch[...] = lax.fori_loop(0, tb, step, h_scratch[...],
                                       unroll=True)

        # (3) Fused fc projection over the rnn block already resident in VMEM:
        #     one lane-dense (tb*bb, Hp) @ (Hp, Op) matmul, no HBM roundtrip.
        rnn_blk = rnn_ref[...].reshape(tb * bb, hp).astype(matmul_dtype)
        out_ref[...] = (
            jnp.dot(rnn_blk, w_fc_ref[...],
                    preferred_element_type=jnp.float32)
            + b_fc_ref[...]
        ).reshape(tb, bb, -1).astype(out_ref.dtype)

    return kernel


def _invariant_spec(block_shape, single_buffer):
    """BlockSpec for an operand that is the same for every grid step."""
    ndim = len(block_shape)
    index_map = lambda b, t: (0,) * ndim
    if single_buffer:
        # Invariant blocks do not need double-buffering; halves their VMEM.
        return pl.BlockSpec(block_shape, index_map,
                            pipeline_mode=pl.Buffered(1))
    return pl.BlockSpec(block_shape, index_map)


def rnn_net_forward(x, w_in, b_in, w_hh, b_hh, w_fc, b_fc, dt=None,
                    matmul_dtype=jnp.bfloat16, t_block=16, b_block=None,
                    single_buffer_weights=False):
    """Pallas implementation of RNNNet.forward.

    Args:
      x: (seq_len, batch, input_size) float32
      w_in: (hidden, input)   b_in: (hidden,)     -- input2h (PyTorch layout)
      w_hh: (hidden, hidden)  b_hh: (hidden,)     -- h2h
      w_fc: (output, hidden)  b_fc: (output,)     -- fc
      matmul_dtype: dtype of MXU operands (bf16 fast path / f32 validation).
      t_block: timesteps per grid step (unrolled inside the kernel).
      b_block: batch rows per grid step; defaults to the whole (padded) batch,
        or two shards when batch >= 16 so megacore parts (v7x) can use both
        TensorCores on the otherwise-sequential recurrence.
      single_buffer_weights: single-buffer the invariant weight/bias blocks
        (useful on v7x with large hidden sizes; off by default).
    Returns:
      out: (seq_len, batch, output_size), rnn_output: (seq_len, batch, hidden)
    """
    tau = 100.0
    alpha = 1.0 if dt is None else float(dt) / tau

    T, B, I = x.shape
    H = w_in.shape[0]
    O = w_fc.shape[0]

    t_block = max(1, min(int(t_block), T))
    Tp = _round_up(T, t_block)
    Bp0 = _round_up(B, 8)              # sublane alignment
    if b_block is None:
        # Two batch shards (>= 8 rows each) when the batch is large enough, so
        # the leading "parallel" grid axis maps onto both TensorCores on v7x.
        b_block = Bp0 if Bp0 < 16 else min(_round_up((Bp0 + 1) // 2, 8), 512)
    b_block = max(8, _round_up(min(int(b_block), Bp0), 8))
    Bp = _round_up(Bp0, b_block)
    Ip = _round_up(I, 128)             # lane alignment
    Hp = _round_up(H, 128)
    Op = _round_up(O, 128)

    x_p = _pad_to(jnp.asarray(x, jnp.float32), (Tp, Bp, Ip)).astype(matmul_dtype)

    # Pre-transpose weights to (in, out), zero-pad, cast matmul operands.
    w_in_t = _pad_to(jnp.asarray(w_in, jnp.float32).T, (Ip, Hp)).astype(matmul_dtype)
    w_hh_t = _pad_to(jnp.asarray(w_hh, jnp.float32).T, (Hp, Hp)).astype(matmul_dtype)
    w_fc_t = _pad_to(jnp.asarray(w_fc, jnp.float32).T, (Hp, Op)).astype(matmul_dtype)
    # b_in + b_hh fused into a single pre-activation bias (off the hot path).
    b_pre = _pad_to((jnp.asarray(b_in, jnp.float32)
                     + jnp.asarray(b_hh, jnp.float32)).reshape(1, H), (1, Hp))
    b_fc2 = _pad_to(jnp.asarray(b_fc, jnp.float32).reshape(1, O), (1, Op))

    # Explicit scoped-VMEM budget (defaults: 16 MiB v5e / 32 MiB v6e,v7x).
    mmb = jnp.dtype(matmul_dtype).itemsize
    blk_bytes = t_block * b_block * (Ip * mmb + Hp * 4 + Op * 4)   # x + rnn + out
    w_bytes = (Ip * Hp + Hp * Hp + Hp * Op) * mmb + (Hp + Op) * 4
    scratch_bytes = b_block * Hp * 4 + t_block * b_block * Hp * 4
    vmem_need = 2 * (blk_bytes + w_bytes) + scratch_bytes
    # Cap at 64 MiB so the same sizing stays inside v7x's physical VMEM.
    vmem_limit = int(min(max(2 * vmem_need + (2 << 20), 32 << 20), 64 << 20))

    grid = (Bp // b_block, Tp // t_block)

    rnn_p, out_p = pl.pallas_call(
        _make_rnn_kernel(alpha, matmul_dtype),
        out_shape=(
            jax.ShapeDtypeStruct((Tp, Bp, Hp), jnp.float32),   # rnn output
            jax.ShapeDtypeStruct((Tp, Bp, Op), jnp.float32),   # fc output
        ),
        grid_spec=pltpu.PrefetchScalarGridSpec(
            num_scalar_prefetch=0,
            grid=grid,
            in_specs=[
                pl.BlockSpec((t_block, b_block, Ip), lambda b, t: (t, b, 0)),
                _invariant_spec((Ip, Hp), single_buffer_weights),  # w_in^T
                _invariant_spec((1, Hp), single_buffer_weights),   # b_in + b_hh
                _invariant_spec((Hp, Hp), single_buffer_weights),  # w_hh^T
                _invariant_spec((Hp, Op), single_buffer_weights),  # w_fc^T
                _invariant_spec((1, Op), single_buffer_weights),   # b_fc
            ],
            out_specs=[
                pl.BlockSpec((t_block, b_block, Hp), lambda b, t: (t, b, 0)),
                pl.BlockSpec((t_block, b_block, Op), lambda b, t: (t, b, 0)),
            ],
            scratch_shapes=[
                pltpu.VMEM((b_block, Hp), jnp.float32),            # carried h
                pltpu.VMEM((t_block, b_block, Hp), jnp.float32),   # pre-activations
            ],
        ),
        compiler_params=pltpu.CompilerParams(
            # Batch shards are independent (megacore-parallel on v7x); the time
            # axis carries h in scratch and must stay sequential ("arbitrary").
            dimension_semantics=("parallel", "arbitrary"),
            vmem_limit_bytes=vmem_limit,
        ),
    )(x_p, w_in_t, b_pre, w_hh_t, w_fc_t, b_fc2)

    out = out_p[:T, :B, :O]
    rnn_out = rnn_p[:T, :B, :H]
    return out, rnn_out


def _reference_forward(x, w_in, b_in, w_hh, b_hh, w_fc, b_fc, dt=None):
    """Pure-JAX reference mirroring the PyTorch module (for sanity checking)."""
    tau = 100.0
    alpha = 1.0 if dt is None else float(dt) / tau
    seq_len, B, _ = x.shape
    H = w_in.shape[0]
    h = jnp.zeros((B, H), jnp.float32)
    outs = []
    for t in range(seq_len):
        ix = x[t] @ w_in.T + b_in
        hh = h @ w_hh.T + b_hh
        h_new = jnp.maximum(ix + hh, 0.0)
        h = h * (1.0 - alpha) + h_new * alpha
        outs.append(h)
    rnn_out = jnp.stack(outs, axis=0)
    out = rnn_out @ w_fc.T + b_fc
    return out, rnn_out


if __name__ == "__main__":
    seq_len, batch, input_size, hidden_size, output_size = 8, 2, 4, 32, 4

    key = jax.random.PRNGKey(0)
    keys = jax.random.split(key, 7)

    def _uni(k, shape, fan_in):
        bound = 1.0 / (fan_in ** 0.5)
        return jax.random.uniform(k, shape, jnp.float32, -bound, bound)

    x = jax.random.normal(keys[0], (seq_len, batch, input_size), jnp.float32)
    w_in = _uni(keys[1], (hidden_size, input_size), input_size)
    b_in = _uni(keys[2], (hidden_size,), input_size)
    w_hh = _uni(keys[3], (hidden_size, hidden_size), hidden_size)
    b_hh = _uni(keys[4], (hidden_size,), hidden_size)
    w_fc = _uni(keys[5], (output_size, hidden_size), hidden_size)
    b_fc = _uni(keys[6], (output_size,), hidden_size)

    # --- dt=None (alpha == 1): specialized recurrence path -------------------
    ref_out, ref_rnn = _reference_forward(x, w_in, b_in, w_hh, b_hh, w_fc, b_fc)

    # Fast path: bf16 MXU operands, f32 accumulation / state.
    out, rnn_out = rnn_net_forward(x, w_in, b_in, w_hh, b_hh, w_fc, b_fc,
                                   matmul_dtype=jnp.bfloat16)
    jax.block_until_ready((out, rnn_out))
    assert out.shape == (seq_len, batch, output_size)
    assert rnn_out.shape == (seq_len, batch, hidden_size)
    assert jnp.allclose(out, ref_out, atol=5e-2, rtol=5e-2)
    assert jnp.allclose(rnn_out, ref_rnn, atol=5e-2, rtol=5e-2)

    # Validation path: full f32 matmuls, tight tolerance.
    out32, rnn32 = rnn_net_forward(x, w_in, b_in, w_hh, b_hh, w_fc, b_fc,
                                   matmul_dtype=jnp.float32)
    jax.block_until_ready((out32, rnn32))
    assert jnp.allclose(out32, ref_out, atol=1e-4, rtol=1e-4)
    assert jnp.allclose(rnn32, ref_rnn, atol=1e-4, rtol=1e-4)

    # --- dt=20 (alpha = 0.2): general leaky-update path ----------------------
    ref_out_dt, ref_rnn_dt = _reference_forward(x, w_in, b_in, w_hh, b_hh,
                                                w_fc, b_fc, dt=20)
    out_dt, rnn_dt = rnn_net_forward(x, w_in, b_in, w_hh, b_hh, w_fc, b_fc,
                                     dt=20, matmul_dtype=jnp.float32)
    jax.block_until_ready((out_dt, rnn_dt))
    assert jnp.allclose(out_dt, ref_out_dt, atol=1e-4, rtol=1e-4)
    assert jnp.allclose(rnn_dt, ref_rnn_dt, atol=1e-4, rtol=1e-4)

    print("KERNEL_OK")
</pallas_src>

<mosaic_0001>
module attributes {stable_mosaic.version = 11 : i64} {
  func.func @kernel(%arg0: i32, %arg1: i32, %arg2: memref<8x8x128xbf16, #tpu.memory_space<vmem>>, %arg3: memref<128x128xbf16, #tpu.memory_space<vmem>>, %arg4: memref<1x128xf32, #tpu.memory_space<vmem>>, %arg5: memref<128x128xbf16, #tpu.memory_space<vmem>>, %arg6: memref<128x128xbf16, #tpu.memory_space<vmem>>, %arg7: memref<1x128xf32, #tpu.memory_space<vmem>>, %arg8: memref<8x8x128xf32, #tpu.memory_space<vmem>>, %arg9: memref<8x8x128xf32, #tpu.memory_space<vmem>>, %arg10: memref<8x128xf32, #tpu.memory_space<vmem>>, %arg11: memref<8x8x128xf32, #tpu.memory_space<vmem>>) attributes {dimension_semantics = [#tpu.dimension_semantics<parallel>, #tpu.dimension_semantics<arbitrary>], iteration_bounds = array<i64: 1, 1>, scalar_prefetch = 0 : i64, scratch_operands = 2 : i64, tpu.core_type = #tpu.core_type<tc>, window_params = [{transform_indices = @transform_0, window_bounds = array<i64: 8, 8, 128>}, {pipeline_mode = #tpu.pipeline_mode<synchronous>, transform_indices = @transform_1, window_bounds = array<i64: 128, 128>}, {pipeline_mode = #tpu.pipeline_mode<synchronous>, transform_indices = @transform_2, window_bounds = array<i64: 1, 128>}, {pipeline_mode = #tpu.pipeline_mode<synchronous>, transform_indices = @transform_3, window_bounds = array<i64: 128, 128>}, {pipeline_mode = #tpu.pipeline_mode<synchronous>, transform_indices = @transform_4, window_bounds = array<i64: 128, 128>}, {pipeline_mode = #tpu.pipeline_mode<synchronous>, transform_indices = @transform_5, window_bounds = array<i64: 1, 128>}, {transform_indices = @transform_6, window_bounds = array<i64: 8, 8, 128>}, {transform_indices = @transform_7, window_bounds = array<i64: 8, 8, 128>}]} {
    %c0_i32 = arith.constant 0 : i32
    %0 = arith.cmpi eq, %arg1, %c0_i32 : i32
    %1 = arith.extui %0 : i1 to i32
    %c0_i32_0 = arith.constant 0 : i32
    %2 = arith.cmpi ne, %1, %c0_i32_0 : i32
    scf.if %2 {
      %cst_76 = arith.constant 0.000000e+00 : f32
      %121 = vector.broadcast %cst_76 : f32 to vector<8x128xf32>
      %c0_77 = arith.constant 0 : index
      %c0_78 = arith.constant 0 : index
      %122 = vector.load %arg10[%c0_77, %c0_78] : memref<8x128xf32, #tpu.memory_space<vmem>>, vector<8x128xf32>
      tpu.vector_store %arg10[%c0_77, %c0_78], %121 {strides = array<i32>} : memref<8x128xf32, #tpu.memory_space<vmem>>, vector<8x128xf32>,
    } else {
    }
    %c0 = arith.constant 0 : index
    %c0_1 = arith.constant 0 : index
    %c0_2 = arith.constant 0 : index
    %3 = vector.load %arg2[%c0, %c0_1, %c0_2] : memref<8x8x128xbf16, #tpu.memory_space<vmem>>, vector<8x8x128xbf16>
    %4 = vector.shape_cast %3 : vector<8x8x128xbf16> to vector<64x128xbf16>
    %c0_3 = arith.constant 0 : index
    %c0_4 = arith.constant 0 : index
    %5 = vector.load %arg3[%c0_3, %c0_4] : memref<128x128xbf16, #tpu.memory_space<vmem>>, vector<128x128xbf16>
    %cst = arith.constant dense<0.000000e+00> : vector<64x128xf32>
    %6 = tpu.matmul %4, %5, %cst {dimension_numbers = #tpu.dot_dimension_numbers<[1], [0], [0], [1], [0, 0, 1, 1], [], []>} : vector<64x128xbf16>, vector<128x128xbf16>, vector<64x128xf32> -> vector<64x128xf32>
    %c0_5 = arith.constant 0 : index
    %c0_6 = arith.constant 0 : index
    %7 = vector.load %arg4[%c0_5, %c0_6] : memref<1x128xf32, #tpu.memory_space<vmem>>, vector<1x128xf32>
    %8 = vector.broadcast %7 : vector<1x128xf32> to vector<64x128xf32>
    %9 = arith.addf %6, %8 : vector<64x128xf32>
    %10 = vector.shape_cast %9 : vector<64x128xf32> to vector<8x8x128xf32>
    %c0_7 = arith.constant 0 : index
    %c0_8 = arith.constant 0 : index
    %c0_9 = arith.constant 0 : index
    %11 = vector.load %arg11[%c0_7, %c0_8, %c0_9] : memref<8x8x128xf32, #tpu.memory_space<vmem>>, vector<8x8x128xf32>
    tpu.vector_store %arg11[%c0_7, %c0_8, %c0_9], %10 {strides = array<i32>} : memref<8x8x128xf32, #tpu.memory_space<vmem>>, vector<8x8x128xf32>,
    %c0_10 = arith.constant 0 : index
    %c0_11 = arith.constant 0 : index
    %12 = vector.load %arg5[%c0_10, %c0_11] : memref<128x128xbf16, #tpu.memory_space<vmem>>, vector<128x128xbf16>
    %c0_12 = arith.constant 0 : index
    %c0_13 = arith.constant 0 : index
    %13 = vector.load %arg10[%c0_12, %c0_13] : memref<8x128xf32, #tpu.memory_space<vmem>>, vector<8x128xf32>
    %c0_i32_14 = arith.constant 0 : i32
    %14 = arith.truncf %13 : vector<8x128xf32> to vector<8x128xbf16>
    %cst_15 = arith.constant dense<0.000000e+00> : vector<8x128xf32>
    %15 = tpu.matmul %14, %12, %cst_15 {dimension_numbers = #tpu.dot_dimension_numbers<[1], [0], [0], [1], [0, 0, 1, 1], [], []>} : vector<8x128xbf16>, vector<128x128xbf16>, vector<8x128xf32> -> vector<8x128xf32>
    %16 = arith.index_cast %c0_i32_14 : i32 to index
    %c0_16 = arith.constant 0 : index
    %c0_17 = arith.constant 0 : index
    %17 = vector.load %arg11[%16, %c0_16, %c0_17] : memref<8x8x128xf32, #tpu.memory_space<vmem>>, vector<1x8x128xf32>
    %18 = vector.shape_cast %17 : vector<1x8x128xf32> to vector<8x128xf32>
    %19 = arith.addf %18, %15 : vector<8x128xf32>
    %cst_18 = arith.constant 0.000000e+00 : f32
    %20 = vector.broadcast %cst_18 : f32 to vector<8x128xf32>
    %21 = arith.maximumf %19, %20 : vector<8x128xf32>
    %22 = arith.index_cast %c0_i32_14 : i32 to index
    %c0_19 = arith.constant 0 : index
    %c0_20 = arith.constant 0 : index
    %23 = vector.load %arg8[%22, %c0_19, %c0_20] : memref<8x8x128xf32, #tpu.memory_space<vmem>>, vector<1x8x128xf32>
    %24 = vector.shape_cast %23 : vector<1x8x128xf32> to vector<8x128xf32>
    %25 = vector.shape_cast %21 : vector<8x128xf32> to vector<1x8x128xf32>
    tpu.vector_store %arg8[%22, %c0_19, %c0_20], %25 {strides = array<i32>} : memref<8x8x128xf32, #tpu.memory_space<vmem>>, vector<1x8x128xf32>,
    %c1_i32 = arith.constant 1 : i32
    %26 = arith.truncf %21 : vector<8x128xf32> to vector<8x128xbf16>
    %cst_21 = arith.constant dense<0.000000e+00> : vector<8x128xf32>
    %27 = tpu.matmul %26, %12, %cst_21 {dimension_numbers = #tpu.dot_dimension_numbers<[1], [0], [0], [1], [0, 0, 1, 1], [], []>} : vector<8x128xbf16>, vector<128x128xbf16>, vector<8x128xf32> -> vector<8x128xf32>
    %28 = arith.index_cast %c1_i32 : i32 to index
    %c0_22 = arith.constant 0 : index
    %c0_23 = arith.constant 0 : index
    %29 = vector.load %arg11[%28, %c0_22, %c0_23] : memref<8x8x128xf32, #tpu.memory_space<vmem>>, vector<1x8x128xf32>
    %30 = vector.shape_cast %29 : vector<1x8x128xf32> to vector<8x128xf32>
    %31 = arith.addf %30, %27 : vector<8x128xf32>
    %cst_24 = arith.constant 0.000000e+00 : f32
    %32 = vector.broadcast %cst_24 : f32 to vector<8x128xf32>
    %33 = arith.maximumf %31, %32 : vector<8x128xf32>
    %34 = arith.index_cast %c1_i32 : i32 to index
    %c0_25 = arith.constant 0 : index
    %c0_26 = arith.constant 0 : index
    %35 = vector.load %arg8[%34, %c0_25, %c0_26] : memref<8x8x128xf32, #tpu.memory_space<vmem>>, vector<1x8x128xf32>
    %36 = vector.shape_cast %35 : vector<1x8x128xf32> to vector<8x128xf32>
    %37 = vector.shape_cast %33 : vector<8x128xf32> to vector<1x8x128xf32>
    tpu.vector_store %arg8[%34, %c0_25, %c0_26], %37 {strides = array<i32>} : memref<8x8x128xf32, #tpu.memory_space<vmem>>, vector<1x8x128xf32>,
    %c2_i32 = arith.constant 2 : i32
    %38 = arith.truncf %33 : vector<8x128xf32> to vector<8x128xbf16>
    %cst_27 = arith.constant dense<0.000000e+00> : vector<8x128xf32>
    %39 = tpu.matmul %38, %12, %cst_27 {dimension_numbers = #tpu.dot_dimension_numbers<[1], [0], [0], [1], [0, 0, 1, 1], [], []>} : vector<8x128xbf16>, vector<128x128xbf16>, vector<8x128xf32> -> vector<8x128xf32>
    %40 = arith.index_cast %c2_i32 : i32 to index
    %c0_28 = arith.constant 0 : index
    %c0_29 = arith.constant 0 : index
    %41 = vector.load %arg11[%40, %c0_28, %c0_29] : memref<8x8x128xf32, #tpu.memory_space<vmem>>, vector<1x8x128xf32>
    %42 = vector.shape_cast %41 : vector<1x8x128xf32> to vector<8x128xf32>
    %43 = arith.addf %42, %39 : vector<8x128xf32>
    %cst_30 = arith.constant 0.000000e+00 : f32
    %44 = vector.broadcast %cst_30 : f32 to vector<8x128xf32>
    %45 = arith.maximumf %43, %44 : vector<8x128xf32>
    %46 = arith.index_cast %c2_i32 : i32 to index
    %c0_31 = arith.constant 0 : index
    %c0_32 = arith.constant 0 : index
    %47 = vector.load %arg8[%46, %c0_31, %c0_32] : memref<8x8x128xf32, #tpu.memory_space<vmem>>, vector<1x8x128xf32>
    %48 = vector.shape_cast %47 : vector<1x8x128xf32> to vector<8x128xf32>
    %49 = vector.shape_cast %45 : vector<8x128xf32> to vector<1x8x128xf32>
    tpu.vector_store %arg8[%46, %c0_31, %c0_32], %49 {strides = array<i32>} : memref<8x8x128xf32, #tpu.memory_space<vmem>>, vector<1x8x128xf32>,
    %c3_i32 = arith.constant 3 : i32
    %50 = arith.truncf %45 : vector<8x128xf32> to vector<8x128xbf16>
    %cst_33 = arith.constant dense<0.000000e+00> : vector<8x128xf32>
    %51 = tpu.matmul %50, %12, %cst_33 {dimension_numbers = #tpu.dot_dimension_numbers<[1], [0], [0], [1], [0, 0, 1, 1], [], []>} : vector<8x128xbf16>, vector<128x128xbf16>, vector<8x128xf32> -> vector<8x128xf32>
    %52 = arith.index_cast %c3_i32 : i32 to index
    %c0_34 = arith.constant 0 : index
    %c0_35 = arith.constant 0 : index
    %53 = vector.load %arg11[%52, %c0_34, %c0_35] : memref<8x8x128xf32, #tpu.memory_space<vmem>>, vector<1x8x128xf32>
    %54 = vector.shape_cast %53 : vector<1x8x128xf32> to vector<8x128xf32>
    %55 = arith.addf %54, %51 : vector<8x128xf32>
    %cst_36 = arith.constant 0.000000e+00 : f32
    %56 = vector.broadcast %cst_36 : f32 to vector<8x128xf32>
    %57 = arith.maximumf %55, %56 : vector<8x128xf32>
    %58 = arith.index_cast %c3_i32 : i32 to index
    %c0_37 = arith.constant 0 : index
    %c0_38 = arith.constant 0 : index
    %59 = vector.load %arg8[%58, %c0_37, %c0_38] : memref<8x8x128xf32, #tpu.memory_space<vmem>>, vector<1x8x128xf32>
    %60 = vector.shape_cast %59 : vector<1x8x128xf32> to vector<8x128xf32>
    %61 = vector.shape_cast %57 : vector<8x128xf32> to vector<1x8x128xf32>
    tpu.vector_store %arg8[%58, %c0_37, %c0_38], %61 {strides = array<i32>} : memref<8x8x128xf32, #tpu.memory_space<vmem>>, vector<1x8x128xf32>,
    %c4_i32 = arith.constant 4 : i32
    %62 = arith.truncf %57 : vector<8x128xf32> to vector<8x128xbf16>
    %cst_39 = arith.constant dense<0.000000e+00> : vector<8x128xf32>
    %63 = tpu.matmul %62, %12, %cst_39 {dimension_numbers = #tpu.dot_dimension_numbers<[1], [0], [0], [1], [0, 0, 1, 1], [], []>} : vector<8x128xbf16>, vector<128x128xbf16>, vector<8x128xf32> -> vector<8x128xf32>
    %64 = arith.index_cast %c4_i32 : i32 to index
    %c0_40 = arith.constant 0 : index
    %c0_41 = arith.constant 0 : index
    %65 = vector.load %arg11[%64, %c0_40, %c0_41] : memref<8x8x128xf32, #tpu.memory_space<vmem>>, vector<1x8x128xf32>
    %66 = vector.shape_cast %65 : vector<1x8x128xf32> to vector<8x128xf32>
    %67 = arith.addf %66, %63 : vector<8x128xf32>
    %cst_42 = arith.constant 0.000000e+00 : f32
    %68 = vector.broadcast %cst_42 : f32 to vector<8x128xf32>
    %69 = arith.maximumf %67, %68 : vector<8x128xf32>
    %70 = arith.index_cast %c4_i32 : i32 to index
    %c0_43 = arith.constant 0 : index
    %c0_44 = arith.constant 0 : index
    %71 = vector.load %arg8[%70, %c0_43, %c0_44] : memref<8x8x128xf32, #tpu.memory_space<vmem>>, vector<1x8x128xf32>
    %72 = vector.shape_cast %71 : vector<1x8x128xf32> to vector<8x128xf32>
    %73 = vector.shape_cast %69 : vector<8x128xf32> to vector<1x8x128xf32>
    tpu.vector_store %arg8[%70, %c0_43, %c0_44], %73 {strides = array<i32>} : memref<8x8x128xf32, #tpu.memory_space<vmem>>, vector<1x8x128xf32>,
    %c5_i32 = arith.constant 5 : i32
    %74 = arith.truncf %69 : vector<8x128xf32> to vector<8x128xbf16>
    %cst_45 = arith.constant dense<0.000000e+00> : vector<8x128xf32>
    %75 = tpu.matmul %74, %12, %cst_45 {dimension_numbers = #tpu.dot_dimension_numbers<[1], [0], [0], [1], [0, 0, 1, 1], [], []>} : vector<8x128xbf16>, vector<128x128xbf16>, vector<8x128xf32> -> vector<8x128xf32>
    %76 = arith.index_cast %c5_i32 : i32 to index
    %c0_46 = arith.constant 0 : index
    %c0_47 = arith.constant 0 : index
    %77 = vector.load %arg11[%76, %c0_46, %c0_47] : memref<8x8x128xf32, #tpu.memory_space<vmem>>, vector<1x8x128xf32>
    %78 = vector.shape_cast %77 : vector<1x8x128xf32> to vector<8x128xf32>
    %79 = arith.addf %78, %75 : vector<8x128xf32>
    %cst_48 = arith.constant 0.000000e+00 : f32
    %80 = vector.broadcast %cst_48 : f32 to vector<8x128xf32>
    %81 = arith.maximumf %79, %80 : vector<8x128xf32>
    %82 = arith.index_cast %c5_i32 : i32 to index
    %c0_49 = arith.constant 0 : index
    %c0_50 = arith.constant 0 : index
    %83 = vector.load %arg8[%82, %c0_49, %c0_50] : memref<8x8x128xf32, #tpu.memory_space<vmem>>, vector<1x8x128xf32>
    %84 = vector.shape_cast %83 : vector<1x8x128xf32> to vector<8x128xf32>
    %85 = vector.shape_cast %81 : vector<8x128xf32> to vector<1x8x128xf32>
    tpu.vector_store %arg8[%82, %c0_49, %c0_50], %85 {strides = array<i32>} : memref<8x8x128xf32, #tpu.memory_space<vmem>>, vector<1x8x128xf32>,
    %c6_i32 = arith.constant 6 : i32
    %86 = arith.truncf %81 : vector<8x128xf32> to vector<8x128xbf16>
    %cst_51 = arith.constant dense<0.000000e+00> : vector<8x128xf32>
    %87 = tpu.matmul %86, %12, %cst_51 {dimension_numbers = #tpu.dot_dimension_numbers<[1], [0], [0], [1], [0, 0, 1, 1], [], []>} : vector<8x128xbf16>, vector<128x128xbf16>, vector<8x128xf32> -> vector<8x128xf32>
    %88 = arith.index_cast %c6_i32 : i32 to index
    %c0_52 = arith.constant 0 : index
    %c0_53 = arith.constant 0 : index
    %89 = vector.load %arg11[%88, %c0_52, %c0_53] : memref<8x8x128xf32, #tpu.memory_space<vmem>>, vector<1x8x128xf32>
    %90 = vector.shape_cast %89 : vector<1x8x128xf32> to vector<8x128xf32>
    %91 = arith.addf %90, %87 : vector<8x128xf32>
    %cst_54 = arith.constant 0.000000e+00 : f32
    %92 = vector.broadcast %cst_54 : f32 to vector<8x128xf32>
    %93 = arith.maximumf %91, %92 : vector<8x128xf32>
    %94 = arith.index_cast %c6_i32 : i32 to index
    %c0_55 = arith.constant 0 : index
    %c0_56 = arith.constant 0 : index
    %95 = vector.load %arg8[%94, %c0_55, %c0_56] : memref<8x8x128xf32, #tpu.memory_space<vmem>>, vector<1x8x128xf32>
    %96 = vector.shape_cast %95 : vector<1x8x128xf32> to vector<8x128xf32>
    %97 = vector.shape_cast %93 : vector<8x128xf32> to vector<1x8x128xf32>
    tpu.vector_store %arg8[%94, %c0_55, %c0_56], %97 {strides = array<i32>} : memref<8x8x128xf32, #tpu.memory_space<vmem>>, vector<1x8x128xf32>,
    %c7_i32 = arith.constant 7 : i32
    %98 = arith.truncf %93 : vector<8x128xf32> to vector<8x128xbf16>
    %cst_57 = arith.constant dense<0.000000e+00> : vector<8x128xf32>
    %99 = tpu.matmul %98, %12, %cst_57 {dimension_numbers = #tpu.dot_dimension_numbers<[1], [0], [0], [1], [0, 0, 1, 1], [], []>} : vector<8x128xbf16>, vector<128x128xbf16>, vector<8x128xf32> -> vector<8x128xf32>
    %100 = arith.index_cast %c7_i32 : i32 to index
    %c0_58 = arith.constant 0 : index
    %c0_59 = arith.constant 0 : index
    %101 = vector.load %arg11[%100, %c0_58, %c0_59] : memref<8x8x128xf32, #tpu.memory_space<vmem>>, vector<1x8x128xf32>
    %102 = vector.shape_cast %101 : vector<1x8x128xf32> to vector<8x128xf32>
    %103 = arith.addf %102, %99 : vector<8x128xf32>
    %cst_60 = arith.constant 0.000000e+00 : f32
    %104 = vector.broadcast %cst_60 : f32 to vector<8x128xf32>
    %105 = arith.maximumf %103, %104 : vector<8x128xf32>
    %106 = arith.index_cast %c7_i32 : i32 to index
    %c0_61 = arith.constant 0 : index
    %c0_62 = arith.constant 0 : index
    %107 = vector.load %arg8[%106, %c0_61, %c0_62] : memref<8x8x128xf32, #tpu.memory_space<vmem>>, vector<1x8x128xf32>
    %108 = vector.shape_cast %107 : vector<1x8x128xf32> to vector<8x128xf32>
    %109 = vector.shape_cast %105 : vector<8x128xf32> to vector<1x8x128xf32>
    tpu.vector_store %arg8[%106, %c0_61, %c0_62], %109 {strides = array<i32>} : memref<8x8x128xf32, #tpu.memory_space<vmem>>, vector<1x8x128xf32>,
    %c8_i32 = arith.constant 8 : i32
    %c0_63 = arith.constant 0 : index
    %c0_64 = arith.constant 0 : index
    %110 = vector.load %arg10[%c0_63, %c0_64] : memref<8x128xf32, #tpu.memory_space<vmem>>, vector<8x128xf32>
    tpu.vector_store %arg10[%c0_63, %c0_64], %105 {strides = array<i32>} : memref<8x128xf32, #tpu.memory_space<vmem>>, vector<8x128xf32>,
    %c0_65 = arith.constant 0 : index
    %c0_66 = arith.constant 0 : index
    %c0_67 = arith.constant 0 : index
    %111 = vector.load %arg8[%c0_65, %c0_66, %c0_67] : memref<8x8x128xf32, #tpu.memory_space<vmem>>, vector<8x8x128xf32>
    %112 = vector.shape_cast %111 : vector<8x8x128xf32> to vector<64x128xf32>
    %113 = arith.truncf %112 : vector<64x128xf32> to vector<64x128xbf16>
    %c0_68 = arith.constant 0 : index
    %c0_69 = arith.constant 0 : index
    %114 = vector.load %arg6[%c0_68, %c0_69] : memref<128x128xbf16, #tpu.memory_space<vmem>>, vector<128x128xbf16>
    %cst_70 = arith.constant dense<0.000000e+00> : vector<64x128xf32>
    %115 = tpu.matmul %113, %114, %cst_70 {dimension_numbers = #tpu.dot_dimension_numbers<[1], [0], [0], [1], [0, 0, 1, 1], [], []>} : vector<64x128xbf16>, vector<128x128xbf16>, vector<64x128xf32> -> vector<64x128xf32>
    %c0_71 = arith.constant 0 : index
    %c0_72 = arith.constant 0 : index
    %116 = vector.load %arg7[%c0_71, %c0_72] : memref<1x128xf32, #tpu.memory_space<vmem>>, vector<1x128xf32>
    %117 = vector.broadcast %116 : vector<1x128xf32> to vector<64x128xf32>
    %118 = arith.addf %115, %117 : vector<64x128xf32>
    %119 = vector.shape_cast %118 : vector<64x128xf32> to vector<8x8x128xf32>
    %c0_73 = arith.constant 0 : index
    %c0_74 = arith.constant 0 : index
    %c0_75 = arith.constant 0 : index
    %120 = vector.load %arg9[%c0_73, %c0_74, %c0_75] : memref<8x8x128xf32, #tpu.memory_space<vmem>>, vector<8x8x128xf32>
    tpu.vector_store %arg9[%c0_73, %c0_74, %c0_75], %119 {strides = array<i32>} : memref<8x8x128xf32, #tpu.memory_space<vmem>>, vector<8x8x128xf32>,
    return
  }
  func.func @transform_0(%arg0: i32, %arg1: i32) -> (i32, i32, i32) {
    %c0_i32 = arith.constant 0 : i32
    %c0_i32_0 = arith.constant 0 : i32
    return %arg1, %arg0, %c0_i32 : i32, i32, i32
  }
  func.func @transform_1(%arg0: i32, %arg1: i32) -> (i32, i32) {
    %c0_i32 = arith.constant 0 : i32
    %c0_i32_0 = arith.constant 0 : i32
    %c0_i32_1 = arith.constant 0 : i32
    return %c0_i32, %c0_i32_0 : i32, i32
  }
  func.func @transform_2(%arg0: i32, %arg1: i32) -> (i32, i32) {
    %c0_i32 = arith.constant 0 : i32
    %c0_i32_0 = arith.constant 0 : i32
    %c0_i32_1 = arith.constant 0 : i32
    return %c0_i32, %c0_i32_0 : i32, i32
  }
  func.func @transform_3(%arg0: i32, %arg1: i32) -> (i32, i32) {
    %c0_i32 = arith.constant 0 : i32
    %c0_i32_0 = arith.constant 0 : i32
    %c0_i32_1 = arith.constant 0 : i32
    return %c0_i32, %c0_i32_0 : i32, i32
  }
  func.func @transform_4(%arg0: i32, %arg1: i32) -> (i32, i32) {
    %c0_i32 = arith.constant 0 : i32
    %c0_i32_0 = arith.constant 0 : i32
    %c0_i32_1 = arith.constant 0 : i32
    return %c0_i32, %c0_i32_0 : i32, i32
  }
  func.func @transform_5(%arg0: i32, %arg1: i32) -> (i32, i32) {
    %c0_i32 = arith.constant 0 : i32
    %c0_i32_0 = arith.constant 0 : i32
    %c0_i32_1 = arith.constant 0 : i32
    return %c0_i32, %c0_i32_0 : i32, i32
  }
  func.func @transform_6(%arg0: i32, %arg1: i32) -> (i32, i32, i32) {
    %c0_i32 = arith.constant 0 : i32
    %c0_i32_0 = arith.constant 0 : i32
    return %arg1, %arg0, %c0_i32 : i32, i32, i32
  }
  func.func @transform_7(%arg0: i32, %arg1: i32) -> (i32, i32, i32) {
    %c0_i32 = arith.constant 0 : i32
    %c0_i32_0 = arith.constant 0 : i32
    return %arg1, %arg0, %c0_i32 : i32, i32, i32
  }
}

</mosaic_0001>

<bundles_post_ra>
// kernel: tpu_custom_call.1
= control target key start
LH: loop header
LB: loop body
LE: loop exit
PB: predicated region body
PF: predicated region fallthrough
CT: control target
= control target key end

     0   :  { %13 = vsyncpa [#allocation5], 0  ;;  %s1701_s0 = inlined_call_operand.hbm [shape: bf16[8,8,128], index: 0, kind: input, shape index: {}]   ;;  %s1702_s1 = inlined_call_operand.hbm [shape: bf16[128,128], index: 1, kind: input, shape index: {}]   ;;  %s1703_s2 = inlined_call_operand.vmem [shape: f32[1,128], index: 2, kind: input, shape index: {}]   ;;  %s1704_s3 = inlined_call_operand.hbm [shape: bf16[128,128], index: 3, kind: input, shape index: {}]   ;;  %s1705_s4 = inlined_call_operand.hbm [shape: bf16[128,128], index: 4, kind: input, shape index: {}]   ;;  %s1706_s5 = inlined_call_operand.vmem [shape: f32[1,128], index: 5, kind: input, shape index: {}]   ;;  %s1707_s6 = inlined_call_operand.hbm [shape: f32[8,8,128], index: 6, kind: output, shape index: {0}]   ;;  %s1708_s7 = inlined_call_operand.hbm [shape: f32[8,8,128], index: 7, kind: output, shape index: {1}]  }
   0x1   :  { %14 = vsyncpa [#allocation8], 0 }
   0x2   :  { %15 = vsyncpa [#allocation11], 0 }
   0x3   :  { %16 = vsyncpa [#allocation6], 0 }
   0x4   :  { %17 = vsyncpa [#allocation14], 0  ;;  %s1400_s24 = smov [#allocation7]   ;;  %s1401_s26 = smov [#allocation4]  }
   0x5   :  { %s35_s25 = sshll.u32 %s1400_s24, 4  ;;  %s23_s27 = sshll.u32 %s1401_s26, 4  ;;  %s36_s25 = int_to_ptr.vmem [resolvable:$true] %s35_s25  ;;  %s24_s27 = int_to_ptr.vmem [resolvable:$true] %s23_s27 }
   0x6   :  { %s1278_s28 = scalar_lea.vmem %s36_s25, 1024  ;;  %p1283_p1 = scmp.lt.s32.totalorder %s36_s25, %s36_s25 }
   0x7   :  { %p1279_p0 = scmp.ne.s32.totalorder %s36_s25, %s1278_s28  ;;  %p1284_p2 = scmp.lt.s32.totalorder %s1278_s28, %s1278_s28 }
   0x9   :  { %p1285_p3 = por %p1284_p2, %p1283_p1 }
   0xb   :  { %p1286_p4 = pnand %p1285_p3, %p1279_p0 }
   0xd   :  { %1289 = shalt.err (!%p1286_p4)
}
   0xe   :  { %s1402_s29 = smov 64   ;;  %s1403_s30 = smov 4  }
   0xf   :  { %41 = dma.hbm_to_vmem [thread:$0]  %s1702_s1, 1024, %s36_s25, [#allocation8], %s1402_s29, %s1402_s29, %s1403_s30  }
  0x10   :  { %s1298_s10 = scalar_lea.vmem %s24_s27, 512  ;;  %p1303_p6 = scmp.lt.s32.totalorder %s24_s27, %s24_s27 }
  0x11   :  { %p1299_p5 = scmp.ne.s32.totalorder %s24_s27, %s1298_s10  ;;  %p1304_p7 = scmp.lt.s32.totalorder %s1298_s10, %s1298_s10 }
  0x13   :  { %p1305_p8 = por %p1304_p7, %p1303_p6 }
  0x15   :  { %p1306_p9 = pnand %p1305_p8, %p1299_p5 }
  0x17   :  { %1309 = shalt.err (!%p1306_p9)
}
  0x18   :  { %29 = dma.hbm_to_vmem [thread:$0]  %s1701_s0, 512, %s24_s27, [#allocation5], %s1402_s29, %s1402_s29, %s1403_s30  }
  0x19   :  { %s1404_s13 = smov [#allocation9]   ;;  %s1405_s15 = smov [#allocation10]  }
  0x1a   :  { %s49_s14 = sshll.u32 %s1404_s13, 4  ;;  %s61_s16 = sshll.u32 %s1405_s15, 4  ;;  %s50_s14 = int_to_ptr.vmem [resolvable:$true] %s49_s14  ;;  %s62_s16 = int_to_ptr.vmem [resolvable:$true] %s61_s16 }
  0x1b   :  { %s1318_s1 = scalar_lea.vmem %s50_s14, 1024  ;;  %p1323_p11 = scmp.lt.s32.totalorder %s50_s14, %s50_s14 }
  0x1c   :  { %p1319_p10 = scmp.ne.s32.totalorder %s50_s14, %s1318_s1  ;;  %p1324_p12 = scmp.lt.s32.totalorder %s1318_s1, %s1318_s1 }
  0x1e   :  { %p1325_p13 = por %p1324_p12, %p1323_p11 }
  0x20   :  { %p1326_p0 = pnand %p1325_p13, %p1319_p10 }
  0x22   :  { %1329 = shalt.err (!%p1326_p0)
}
  0x23   :  { %55 = dma.hbm_to_vmem [thread:$0]  %s1704_s3, 1024, %s50_s14, [#allocation8], %s1402_s29, %s1402_s29, %s1403_s30  }
  0x24   :  { %s1338_s0 = scalar_lea.vmem %s62_s16, 1024  ;;  %p1343_p2 = scmp.lt.s32.totalorder %s62_s16, %s62_s16 }
  0x25   :  { %p1339_p1 = scmp.ne.s32.totalorder %s62_s16, %s1338_s0  ;;  %p1344_p3 = scmp.lt.s32.totalorder %s1338_s0, %s1338_s0 }
  0x27   :  { %p1345_p4 = por %p1344_p3, %p1343_p2 }
  0x29   :  { %p1346_p5 = pnand %p1345_p4, %p1339_p1 }
  0x2b   :  { %1349 = shalt.err (!%p1346_p5)
}
  0x2c   :  { %67 = dma.hbm_to_vmem [thread:$0]  %s1705_s4, 1024, %s62_s16, [#allocation11], %s1402_s29, %s1402_s29, %s1403_s30  }
  0x2d   :  { %1390 = dma.done.wait [#allocation5], 512  }
  0x2e   :  { %1391 = vsyncadd [#allocation5], 4294966784 }
  0x2f   :  { %1392 = dma.done.wait [#allocation8], 2048  }
  0x30   :  { %1393 = vsyncadd [#allocation8], 4294965248 }
  0x31   :  { %1394 = dma.done.wait [#allocation11], 1024  }
  0x32   :  { %1395 = vsyncadd [#allocation11], 4294966272  ;;  %v1406_v0 = vmov 0.0   ;;  %vm1407_vm0 = vmmov 0   ;;  %v1242_v1 = vld [vmem:[#allocation7 + $0x38] sm:$0xff]   ;;  %v1244_v3 = vld [vmem:[#allocation7 + $0x30] sm:$0xff]  }
  0x33   :  { %1045 = vmatprep.subr.bf16.mxu1 %v1406_v0  ;;  %1061 = vmatprep.mubr.msk.bf16.mxu1 %vm1407_vm0, %v1406_v0  ;;  %v1480_v2 = vld [vmem:[#allocation9 + $0x38] sm:$0xff]   ;;  %v1483_v4 = vld [vmem:[#allocation9 + $0x30] sm:$0xff]   ;;  %v1246_v5 = vld [vmem:[#allocation7 + $0x28] sm:$0xff]   ;;  %v1408_v20 = vmov 0.0|0.0  }
  0x34   :  { %1021 = vmatprep.subr.bf16.mxu0 %v1242_v1  ;;  %1046 = vmatpush3.bf16.msra.mxu1 %v1480_v2  ;;  %v1487_v6 = vld [vmem:[#allocation9 + $0x28] sm:$0xff]   ;;  %v1248_v7 = vld [vmem:[#allocation7 + $0x20] sm:$0xff]   ;;  %v1250_v9 = vld [vmem:[#allocation7 + $0x18] sm:$0xff]  }
  0x35   :  { %1022 = vmatpush3.bf16.msra.mxu0 %v1242_v1  ;;  %1047 = vmatprep.subr.bf16.mxu1 %v1406_v0  ;;  %v1491_v8 = vld [vmem:[#allocation9 + $0x20] sm:$0xff]   ;;  %v1494_v10 = vld [vmem:[#allocation9 + $0x18] sm:$0xff]   ;;  %v1252_v11 = vld [vmem:[#allocation7 + $0x10] sm:$0xff]  }
  0x36   :  { %1023 = vmatprep.subr.bf16.mxu0 %v1244_v3  ;;  %v1258_v12 = vld [vmem:[#allocation4] sm:$0xff]   ;;  %v1498_v13 = vld [vmem:[#allocation9 + $0x10] sm:$0xff]   ;;  %v1254_v14 = vld [vmem:[#allocation7 + $0x8] sm:$0xff]  }
  0x37   :  { %1037 = vmatprep.mubr.bf16.mxu0 %v1258_v12  ;;  %v1502_v15 = vld [vmem:[#allocation9 + $0x8] sm:$0xff]   ;;  %v1256_v16 = vld [vmem:[#allocation7] sm:$0xff]   ;;  %v1260_v19 = vld [vmem:[#allocation4 + $0x10] sm:$0xff]  }
  0x38   :  { %1048 = vmatpush3.bf16.msra.mxu1 %v1483_v4  ;;  %v1507_v17 = vld [vmem:[#allocation9] sm:$0xff]   ;;  %v1259_v18 = vld [vmem:[#allocation4 + $0x8] sm:$0xff]   ;;  %v1261_v21 = vld [vmem:[#allocation4 + $0x18] sm:$0xff]  }
  0x39   :  { %1024 = vmatpush3.bf16.msra.mxu0 %v1244_v3  ;;  %1049 = vmatprep.subr.bf16.mxu1 %v1406_v0  ;;  %v1552_v22 = vld [vmem:[%s1703_s2] ss:$0 sm:$0xff] }
  0x3a   :  { %1025 = vmatprep.subr.bf16.mxu0 %v1246_v5 }
  0x3c   :  { %1050 = vmatpush3.bf16.msra.mxu1 %v1487_v6 }
  0x3d   :  { %1026 = vmatpush3.bf16.msra.mxu0 %v1246_v5  ;;  %1051 = vmatprep.subr.bf16.mxu1 %v1406_v0 }
  0x3e   :  { %1027 = vmatprep.subr.bf16.mxu0 %v1248_v7 }
  0x40   :  { %1052 = vmatpush3.bf16.msra.mxu1 %v1491_v8 }
  0x41   :  { %1028 = vmatpush3.bf16.msra.mxu0 %v1248_v7  ;;  %1053 = vmatprep.subr.bf16.mxu1 %v1406_v0 }
  0x42   :  { %1029 = vmatprep.subr.bf16.mxu0 %v1250_v9 }
  0x44   :  { %1054 = vmatpush3.bf16.msra.mxu1 %v1494_v10 }
  0x45   :  { %1030 = vmatpush3.bf16.msra.mxu0 %v1250_v9  ;;  %1055 = vmatprep.subr.bf16.mxu1 %v1406_v0 }
  0x46   :  { %1031 = vmatprep.subr.bf16.mxu0 %v1252_v11 }
  0x48   :  { %1056 = vmatpush3.bf16.msra.mxu1 %v1498_v13 }
  0x49   :  { %1032 = vmatpush3.bf16.msra.mxu0 %v1252_v11  ;;  %1057 = vmatprep.subr.bf16.mxu1 %v1406_v0 }
  0x4a   :  { %1033 = vmatprep.subr.bf16.mxu0 %v1254_v14 }
  0x4c   :  { %1058 = vmatpush3.bf16.msra.mxu1 %v1502_v15 }
  0x4d   :  { %1034 = vmatpush3.bf16.msra.mxu0 %v1254_v14  ;;  %1059 = vmatprep.subr.bf16.mxu1 %v1406_v0 }
  0x4e   :  { %1035 = vmatprep.subr.bf16.mxu0 %v1256_v16 }
  0x50   :  { %1060 = vmatpush3.bf16.msra.mxu1 %v1507_v17 }
  0x51   :  { %1036 = vmatpush3.bf16.msra.mxu0 %v1256_v16  ;;  %1085 = vmatprep.subr.bf16.mxu1 %v1406_v0 }
  0x52   :  { %1065 = vmatprep.subr.bf16.mxu0 %v1406_v0 }
  0x53   :  { %1062 = vmatmul.mubr.bf16.vlgmr.msra.gmra.mxu1 %v1408_v20  ;;  %v1263_v20 = vld [vmem:[#allocation10 + $0x30] sm:$0xff]  }
  0x54   :  { %1038 = vmatmul.mubr.bf16.vlgmr.msra.gmra.mxu0 %v1259_v18  ;;  %1086 = vmatpush3.bf16.msra.mxu1 %v1480_v2 }
  0x55   :  { %1066 = vmatpush3.bf16.msra.mxu0 %v1480_v2  ;;  %1041 = vmatprep.mubr.bf16.mxu0 %v1260_v19 }
  0x56   :  { %1067 = vmatprep.subr.bf16.mxu0 %v1406_v0  ;;  %1087 = vmatprep.subr.bf16.mxu1 %v1406_v0 }
  0x57   :  { %1101 = vmatprep.mubr.msk.bf16.mxu1 %vm1407_vm0, %v1406_v0 }
  0x58   :  { %1088 = vmatpush3.bf16.msra.mxu1 %v1483_v4 }
  0x59   :  { %1068 = vmatpush3.bf16.msra.mxu0 %v1483_v4  ;;  %1089 = vmatprep.subr.bf16.mxu1 %v1406_v0 }
  0x5a   :  { %1069 = vmatprep.subr.bf16.mxu0 %v1406_v0 }
  0x5c   :  { %1042 = vmatmul.mubr.bf16.gmra.mxu0 %v1261_v21  ;;  %1090 = vmatpush3.bf16.msra.mxu1 %v1487_v6 }
  0x5d   :  { %1070 = vmatpush3.bf16.msra.mxu0 %v1487_v6  ;;  %1081 = vmatprep.mubr.msk.bf16.mxu0 %vm1407_vm0, %v1406_v0 }
  0x5e   :  { %1071 = vmatprep.subr.bf16.mxu0 %v1406_v0  ;;  %1091 = vmatprep.subr.bf16.mxu1 %v1406_v0 }
  0x60   :  { %1092 = vmatpush3.bf16.msra.mxu1 %v1491_v8 }
  0x61   :  { %1072 = vmatpush3.bf16.msra.mxu0 %v1491_v8  ;;  %1093 = vmatprep.subr.bf16.mxu1 %v1406_v0 }
  0x62   :  { %1073 = vmatprep.subr.bf16.mxu0 %v1406_v0 }
  0x64   :  { %1094 = vmatpush3.bf16.msra.mxu1 %v1494_v10 }
  0x65   :  { %1074 = vmatpush3.bf16.msra.mxu0 %v1494_v10  ;;  %1095 = vmatprep.subr.bf16.mxu1 %v1406_v0 }
  0x66   :  { %1075 = vmatprep.subr.bf16.mxu0 %v1406_v0 }
  0x68   :  { %1096 = vmatpush3.bf16.msra.mxu1 %v1498_v13 }
  0x69   :  { %1076 = vmatpush3.bf16.msra.mxu0 %v1498_v13  ;;  %1097 = vmatprep.subr.bf16.mxu1 %v1406_v0 }
  0x6a   :  { %1077 = vmatprep.subr.bf16.mxu0 %v1406_v0 }
  0x6c   :  { %1098 = vmatpush3.bf16.msra.mxu1 %v1502_v15 }
  0x6d   :  { %1078 = vmatpush3.bf16.msra.mxu0 %v1502_v15  ;;  %1099 = vmatprep.subr.bf16.mxu1 %v1406_v0 }
  0x6e   :  { %1079 = vmatprep.subr.bf16.mxu0 %v1406_v0 }
  0x70   :  { %1100 = vmatpush3.bf16.msra.mxu1 %v1507_v17 }
  0x71   :  { %1080 = vmatpush3.bf16.msra.mxu0 %v1507_v17  ;;  %1125 = vmatprep.subr.bf16.mxu1 %v1406_v0 }
  0x72   :  { %1105 = vmatprep.subr.bf16.mxu0 %v1406_v0 }
 0x113   :  { %v364_v23 = vpop.f32.mrf.mxu1 }
 0x114   :  { %v1039_v24 = vpop.f32.mrf.mxu0 }
 0x115   :  { %v1555_v25 = vadd.f32 %v1039_v24, %v1552_v22  ;;  %v1063_v26 = vpop.f32.mrf.mxu1  ;;  %v1268_v24 = vld [vmem:[#allocation10 + $0x8] sm:$0xff]  }
 0x116   :  { %v225_v27 = vpop.f32.mrf.mxu0 }
 0x117   :  { %v226_v28 = vadd.f32 %v1552_v22, %v225_v27  ;;  %v367_v29 = vpop.f32.mrf.mxu1 }
 0x118   :  { %v1040_v30 = vpop.f32.mrf.mxu0 }
 0x119   :  { %v371_v31 = vadd.f32 %v364_v23, %v226_v28  ;;  %v1559_v32 = vadd.f32 %v1040_v30, %v1552_v22  ;;  %v1064_v33 = vpop.f32.mrf.mxu1  ;;  %v1267_v23 = vld [vmem:[#allocation10 + $0x10] sm:$0xff]  }
 0x11a   :  { %v228_v34 = vpop.f32.mrf.mxu0 }
 0x11b   :  { %v1561_v35 = vmax.f32 %v371_v31, 0.0  ;;  %v229_v44 = vadd.f32 %v1552_v22, %v228_v34 }
 0x11c   :  { %v1043_v36 = vpop.f32.mrf.mxu0 }
 0x11d   :  { %373 = vst [vmem:[#allocation12] sm:$0xff] %v1561_v35  ;;  %v374_v37 = vpack.c.bf16 %v1561_v35, %v1561_v35  ;;  %v1567_v38 = vadd.f32 %v1043_v36, %v1552_v22 }
 0x11e   :  { %v241_v39 = vpop.f32.mrf.mxu0 }
 0x11f   :  { %1082 = vmatmul.mubr.bf16.vlgmr.msra.gmra.mxu0 %v374_v37  ;;  %v1570_v40 = vadd.f32 %v1552_v22, %v241_v39 }
 0x120   :  { %v1044_v41 = vpop.f32.mrf.mxu0  ;;  %1106 = vmatpush3.bf16.msra.mxu0 %v1480_v2  ;;  %1121 = vmatprep.mubr.msk.bf16.mxu0 %vm1407_vm0, %v1406_v0 }
 0x121   :  { %v1576_v42 = vadd.f32 %v1044_v41, %v1552_v22  ;;  %1107 = vmatprep.subr.bf16.mxu0 %v1406_v0 }
 0x122   :  { %v1593_v43 = vpop.f32.mrf.mxu0 }
 0x124   :  { %1108 = vmatpush3.bf16.msra.mxu0 %v1483_v4 }
 0x125   :  { %1109 = vmatprep.subr.bf16.mxu0 %v1406_v0 }
 0x128   :  { %1110 = vmatpush3.bf16.msra.mxu0 %v1487_v6 }
 0x129   :  { %1111 = vmatprep.subr.bf16.mxu0 %v1406_v0 }
 0x12c   :  { %1112 = vmatpush3.bf16.msra.mxu0 %v1491_v8 }
 0x12d   :  { %1113 = vmatprep.subr.bf16.mxu0 %v1406_v0 }
 0x130   :  { %1114 = vmatpush3.bf16.msra.mxu0 %v1494_v10 }
 0x131   :  { %1115 = vmatprep.subr.bf16.mxu0 %v1406_v0 }
 0x134   :  { %1116 = vmatpush3.bf16.msra.mxu0 %v1498_v13 }
 0x135   :  { %1117 = vmatprep.subr.bf16.mxu0 %v1406_v0 }
 0x138   :  { %1118 = vmatpush3.bf16.msra.mxu0 %v1502_v15 }
 0x139   :  { %1119 = vmatprep.subr.bf16.mxu0 %v1406_v0 }
 0x13c   :  { %1120 = vmatpush3.bf16.msra.mxu0 %v1507_v17 }
 0x13d   :  { %1145 = vmatprep.subr.bf16.mxu0 %v1406_v0 }
 0x1df   :  { %v409_v45 = vpop.f32.mrf.mxu0 }
 0x1e0   :  { %v417_v46 = vadd.f32 %v409_v45, %v229_v44 }
 0x1e1   :  { %v1083_v47 = vpop.f32.mrf.mxu0 }
 0x1e2   :  { %v1596_v48 = vmax.f32 %v417_v46, 0.0 }
 0x1e3   :  { %v412_v49 = vpop.f32.mrf.mxu0 }
 0x1e4   :  { %420 = vst [vmem:[#allocation12 + $0x8] sm:$0xff] %v1596_v48  ;;  %v421_v50 = vpack.c.bf16 %v1596_v48, %v1596_v48 }
 0x1e5   :  { %v1084_v51 = vpop.f32.mrf.mxu0 }
 0x1e6   :  { %1102 = vmatmul.mubr.bf16.vlgmr.msra.gmra.mxu1 %v421_v50 }
 0x1e7   :  { %1126 = vmatpush3.bf16.msra.mxu1 %v1480_v2  ;;  %1141 = vmatprep.mubr.msk.bf16.mxu1 %vm1407_vm0, %v1406_v0 }
 0x1e8   :  { %1127 = vmatprep.subr.bf16.mxu1 %v1406_v0 }
 0x1eb   :  { %1128 = vmatpush3.bf16.msra.mxu1 %v1483_v4 }
 0x1ec   :  { %1129 = vmatprep.subr.bf16.mxu1 %v1406_v0 }
 0x1ef   :  { %1130 = vmatpush3.bf16.msra.mxu1 %v1487_v6 }
 0x1f0   :  { %1131 = vmatprep.subr.bf16.mxu1 %v1406_v0 }
 0x1f3   :  { %1132 = vmatpush3.bf16.msra.mxu1 %v1491_v8 }
 0x1f4   :  { %1133 = vmatprep.subr.bf16.mxu1 %v1406_v0 }
 0x1f7   :  { %1134 = vmatpush3.bf16.msra.mxu1 %v1494_v10 }
 0x1f8   :  { %1135 = vmatprep.subr.bf16.mxu1 %v1406_v0 }
 0x1fb   :  { %1136 = vmatpush3.bf16.msra.mxu1 %v1498_v13 }
 0x1fc   :  { %1137 = vmatprep.subr.bf16.mxu1 %v1406_v0 }
 0x1ff   :  { %1138 = vmatpush3.bf16.msra.mxu1 %v1502_v15 }
 0x200   :  { %1139 = vmatprep.subr.bf16.mxu1 %v1406_v0 }
 0x203   :  { %1140 = vmatpush3.bf16.msra.mxu1 %v1507_v17 }
 0x204   :  { %1165 = vmatprep.subr.bf16.mxu1 %v1406_v0 }
 0x2a6   :  { %v456_v52 = vpop.f32.mrf.mxu1 }
 0x2a7   :  { %v464_v53 = vadd.f32 %v456_v52, %v1555_v25  ;;  %v1269_v25 = vld [vmem:[#allocation10] sm:$0xff]  }
 0x2a8   :  { %v1103_v54 = vpop.f32.mrf.mxu1 }
 0x2a9   :  { %v1620_v55 = vmax.f32 %v464_v53, 0.0 }
 0x2aa   :  { %v459_v56 = vpop.f32.mrf.mxu1 }
 0x2ab   :  { %467 = vst [vmem:[#allocation12 + $0x10] sm:$0xff] %v1620_v55  ;;  %v468_v57 = vpack.c.bf16 %v1620_v55, %v1620_v55 }
 0x2ac   :  { %v1104_v58 = vpop.f32.mrf.mxu1 }
 0x2ad   :  { %1122 = vmatmul.mubr.bf16.vlgmr.msra.gmra.mxu0 %v468_v57 }
 0x2ae   :  { %1146 = vmatpush3.bf16.msra.mxu0 %v1480_v2  ;;  %1161 = vmatprep.mubr.msk.bf16.mxu0 %vm1407_vm0, %v1406_v0 }
 0x2af   :  { %1147 = vmatprep.subr.bf16.mxu0 %v1406_v0 }
 0x2b2   :  { %1148 = vmatpush3.bf16.msra.mxu0 %v1483_v4 }
 0x2b3   :  { %1149 = vmatprep.subr.bf16.mxu0 %v1406_v0 }
 0x2b6   :  { %1150 = vmatpush3.bf16.msra.mxu0 %v1487_v6 }
 0x2b7   :  { %1151 = vmatprep.subr.bf16.mxu0 %v1406_v0 }
 0x2ba   :  { %1152 = vmatpush3.bf16.msra.mxu0 %v1491_v8 }
 0x2bb   :  { %1153 = vmatprep.subr.bf16.mxu0 %v1406_v0 }
 0x2be   :  { %1154 = vmatpush3.bf16.msra.mxu0 %v1494_v10 }
 0x2bf   :  { %1155 = vmatprep.subr.bf16.mxu0 %v1406_v0 }
 0x2c2   :  { %1156 = vmatpush3.bf16.msra.mxu0 %v1498_v13 }
 0x2c3   :  { %1157 = vmatprep.subr.bf16.mxu0 %v1406_v0 }
 0x2c6   :  { %1158 = vmatpush3.bf16.msra.mxu0 %v1502_v15 }
 0x2c7   :  { %1159 = vmatprep.subr.bf16.mxu0 %v1406_v0 }
 0x2ca   :  { %1160 = vmatpush3.bf16.msra.mxu0 %v1507_v17 }
 0x2cb   :  { %1185 = vmatprep.subr.bf16.mxu0 %v1406_v0 }
 0x36d   :  { %v503_v59 = vpop.f32.mrf.mxu0 }
 0x36e   :  { %v511_v60 = vadd.f32 %v503_v59, %v1559_v32 }
 0x36f   :  { %v1123_v61 = vpop.f32.mrf.mxu0 }
 0x370   :  { %v1644_v62 = vmax.f32 %v511_v60, 0.0 }
 0x371   :  { %v506_v63 = vpop.f32.mrf.mxu0 }
 0x372   :  { %514 = vst [vmem:[#allocation12 + $0x18] sm:$0xff] %v1644_v62  ;;  %v515_v1 = vpack.c.bf16 %v1644_v62, %v1644_v62  ;;  %v713_v26 = vpack.c.bf16 %v1644_v62, %v1620_v55 }
 0x373   :  { %v1124_v3 = vpop.f32.mrf.mxu0 }
 0x374   :  { %1142 = vmatmul.mubr.bf16.vlgmr.msra.gmra.mxu1 %v515_v1 }
 0x375   :  { %1166 = vmatpush3.bf16.msra.mxu1 %v1480_v2  ;;  %1181 = vmatprep.mubr.msk.bf16.mxu1 %vm1407_vm0, %v1406_v0 }
 0x376   :  { %1167 = vmatprep.subr.bf16.mxu1 %v1406_v0 }
 0x379   :  { %1168 = vmatpush3.bf16.msra.mxu1 %v1483_v4 }
 0x37a   :  { %1169 = vmatprep.subr.bf16.mxu1 %v1406_v0 }
 0x37d   :  { %1170 = vmatpush3.bf16.msra.mxu1 %v1487_v6 }
 0x37e   :  { %1171 = vmatprep.subr.bf16.mxu1 %v1406_v0 }
 0x381   :  { %1172 = vmatpush3.bf16.msra.mxu1 %v1491_v8 }
 0x382   :  { %1173 = vmatprep.subr.bf16.mxu1 %v1406_v0 }
 0x385   :  { %1174 = vmatpush3.bf16.msra.mxu1 %v1494_v10 }
 0x386   :  { %1175 = vmatprep.subr.bf16.mxu1 %v1406_v0 }
 0x389   :  { %1176 = vmatpush3.bf16.msra.mxu1 %v1498_v13 }
 0x38a   :  { %1177 = vmatprep.subr.bf16.mxu1 %v1406_v0 }
 0x38d   :  { %1178 = vmatpush3.bf16.msra.mxu1 %v1502_v15 }
 0x38e   :  { %1179 = vmatprep.subr.bf16.mxu1 %v1406_v0 }
 0x391   :  { %1180 = vmatpush3.bf16.msra.mxu1 %v1507_v17 }
 0x434   :  { %v550_v5 = vpop.f32.mrf.mxu1 }
 0x435   :  { %v558_v7 = vadd.f32 %v550_v5, %v1570_v40 }
 0x436   :  { %v1143_v9 = vpop.f32.mrf.mxu1 }
 0x437   :  { %v559_v11 = vmax.f32 %v558_v7, 0.0 }
 0x438   :  { %v553_v12 = vpop.f32.mrf.mxu1 }
 0x439   :  { %561 = vst [vmem:[#allocation12 + $0x20] sm:$0xff] %v559_v11  ;;  %v562_v14 = vpack.c.bf16 %v559_v11, %v559_v11 }
 0x43a   :  { %v1144_v16 = vpop.f32.mrf.mxu1 }
 0x43b   :  { %1162 = vmatmul.mubr.bf16.vlgmr.msra.gmra.mxu0 %v562_v14 }
 0x43c   :  { %1186 = vmatpush3.bf16.msra.mxu0 %v1480_v2  ;;  %1201 = vmatprep.mubr.msk.bf16.mxu0 %vm1407_vm0, %v1406_v0  ;;  %v1262_v2 = vld [vmem:[#allocation10 + $0x38] sm:$0xff]  }
 0x43d   :  { %1187 = vmatprep.subr.bf16.mxu0 %v1406_v0  ;;  %1205 = vmatprep.subr.bf16.mxu1 %v1262_v2 }
 0x440   :  { %1188 = vmatpush3.bf16.msra.mxu0 %v1483_v4  ;;  %v245_v4 = vadd.f32 %v1552_v22, %v1593_v43  ;;  %v1266_v22 = vld [vmem:[#allocation10 + $0x18] sm:$0xff]  }
 0x441   :  { %1189 = vmatprep.subr.bf16.mxu0 %v1406_v0 }
 0x444   :  { %1190 = vmatpush3.bf16.msra.mxu0 %v1487_v6 }
 0x445   :  { %1191 = vmatprep.subr.bf16.mxu0 %v1406_v0 }
 0x448   :  { %1192 = vmatpush3.bf16.msra.mxu0 %v1491_v8 }
 0x449   :  { %1193 = vmatprep.subr.bf16.mxu0 %v1406_v0 }
 0x44c   :  { %1194 = vmatpush3.bf16.msra.mxu0 %v1494_v10 }
 0x44d   :  { %1195 = vmatprep.subr.bf16.mxu0 %v1406_v0 }
 0x450   :  { %1196 = vmatpush3.bf16.msra.mxu0 %v1498_v13 }
 0x451   :  { %1197 = vmatprep.subr.bf16.mxu0 %v1406_v0 }
 0x454   :  { %1198 = vmatpush3.bf16.msra.mxu0 %v1502_v15  ;;  %v712_v15 = vpack.c.bf16 %v1596_v48, %v1561_v35  ;;  %v916_v35 = vld [vmem:[%s1706_s5] ss:$0 sm:$0xff]  ;;  %s1409_s5 = smov [#allocation12]  }
 0x455   :  { %1199 = vmatprep.subr.bf16.mxu0 %v1406_v0  ;;  %v1264_v0 = vld [vmem:[#allocation10 + $0x28] sm:$0xff]   ;;  %s865_s22 = sshll.u32 %s1409_s5, 4  ;;  %s866_s22 = int_to_ptr.vmem [resolvable:$true] %s865_s22 }
 0x456   :  { %s1350_s23 = scalar_lea.vmem %s866_s22, 1024  ;;  %p1355_p7 = scmp.lt.s32.totalorder %s866_s22, %s866_s22 }
 0x457   :  { %p1351_p6 = scmp.ne.s32.totalorder %s866_s22, %s1350_s23  ;;  %p1356_p8 = scmp.lt.s32.totalorder %s1350_s23, %s1350_s23 }
 0x458   :  { %1200 = vmatpush3.bf16.msra.mxu0 %v1507_v17  ;;  %v1265_v17 = vld [vmem:[#allocation10 + $0x20] sm:$0xff]  }
 0x459   :  { %p1357_p9 = por %p1356_p8, %p1355_p7 }
 0x45b   :  { %p1358_p10 = pnand %p1357_p9, %p1351_p6 }
 0x4fb   :  { %v597_v6 = vpop.f32.mrf.mxu0 }
 0x4fc   :  { %v605_v8 = vadd.f32 %v597_v6, %v245_v4 }
 0x4fd   :  { %v1163_v10 = vpop.f32.mrf.mxu0 }
 0x4fe   :  { %v606_v18 = vmax.f32 %v605_v8, 0.0 }
 0x4ff   :  { %v600_v19 = vpop.f32.mrf.mxu0 }
 0x500   :  { %608 = vst [vmem:[#allocation12 + $0x28] sm:$0xff] %v606_v18  ;;  %v609_v13 = vpack.c.bf16 %v606_v18, %v606_v18  ;;  %v714_v27 = vpack.c.bf16 %v606_v18, %v559_v11 }
 0x501   :  { %v1164_v21 = vpop.f32.mrf.mxu0 }
 0x502   :  { %1182 = vmatmul.mubr.bf16.vlgmr.msra.gmra.mxu1 %v609_v13 }
 0x503   :  { %1206 = vmatpush3.bf16.msra.mxu1 %v1262_v2  ;;  %1221 = vmatprep.mubr.bf16.mxu1 %v712_v15 }
 0x504   :  { %1207 = vmatprep.subr.bf16.mxu1 %v1263_v20 }
 0x507   :  { %1208 = vmatpush3.bf16.msra.mxu1 %v1263_v20 }
 0x508   :  { %1209 = vmatprep.subr.bf16.mxu1 %v1264_v0 }
 0x50b   :  { %1210 = vmatpush3.bf16.msra.mxu1 %v1264_v0 }
 0x50c   :  { %1211 = vmatprep.subr.bf16.mxu1 %v1265_v17 }
 0x50f   :  { %1212 = vmatpush3.bf16.msra.mxu1 %v1265_v17 }
 0x510   :  { %1213 = vmatprep.subr.bf16.mxu1 %v1266_v22 }
 0x513   :  { %1214 = vmatpush3.bf16.msra.mxu1 %v1266_v22 }
 0x514   :  { %1215 = vmatprep.subr.bf16.mxu1 %v1267_v23 }
 0x517   :  { %1216 = vmatpush3.bf16.msra.mxu1 %v1267_v23 }
 0x518   :  { %1217 = vmatprep.subr.bf16.mxu1 %v1268_v24 }
 0x51b   :  { %1218 = vmatpush3.bf16.msra.mxu1 %v1268_v24 }
 0x51c   :  { %1219 = vmatprep.subr.bf16.mxu1 %v1269_v25 }
 0x51f   :  { %1220 = vmatpush3.bf16.msra.mxu1 %v1269_v25 }
 0x522   :  { %1222 = vmatmul.mubr.bf16.vlgmr.msra.gmra.mxu1 %v713_v26 }
 0x523   :  { %1225 = vmatprep.mubr.bf16.mxu1 %v714_v27 }
 0x5c2   :  { %v644_v28 = vpop.f32.mrf.mxu1 }
 0x5c3   :  { %v652_v29 = vadd.f32 %v644_v28, %v1567_v38 }
 0x5c4   :  { %v1183_v30 = vpop.f32.mrf.mxu1 }
 0x5c5   :  { %v653_v31 = vmax.f32 %v652_v29, 0.0 }
 0x5c6   :  { %v647_v32 = vpop.f32.mrf.mxu1 }
 0x5c7   :  { %655 = vst [vmem:[#allocation12 + $0x30] sm:$0xff] %v653_v31  ;;  %v656_v33 = vpack.c.bf16 %v653_v31, %v653_v31 }
 0x5c8   :  { %v1184_v34 = vpop.f32.mrf.mxu1 }
 0x5c9   :  { %1202 = vmatmul.mubr.bf16.vlgmr.msra.gmra.mxu0 %v656_v33 }
 0x5e2   :  { %v1223_v36 = vpop.f32.mrf.mxu1 }
 0x5e3   :  { %v830_v37 = vadd.f32 %v1223_v36, %v916_v35 }
 0x5e4   :  { %v821_v39 = vpop.f32.mrf.mxu1 }
 0x5e5   :  { %854 = vst [vmem:[#allocation13 + $0x10] sm:$0xff] %v830_v37  ;;  %v822_v40 = vadd.f32 %v916_v35, %v821_v39 }
 0x5e6   :  { %v1224_v41 = vpop.f32.mrf.mxu1 }
 0x5e7   :  { %852 = vst [vmem:[#allocation13] sm:$0xff] %v822_v40  ;;  %v833_v43 = vadd.f32 %v1224_v41, %v916_v35 }
 0x5e8   :  { %v824_v38 = vpop.f32.mrf.mxu1 }
 0x5e9   :  { %855 = vst [vmem:[#allocation13 + $0x18] sm:$0xff] %v833_v43  ;;  %v825_v44 = vadd.f32 %v916_v35, %v824_v38 }
 0x5eb   :  { %853 = vst [vmem:[#allocation13 + $0x8] sm:$0xff] %v825_v44 }
 0x689   :  { %v691_v45 = vpop.f32.mrf.mxu0 }
 0x68a   :  { %v699_v46 = vadd.f32 %v691_v45, %v1576_v42 }
 0x68b   :  { %v1203_v47 = vpop.f32.mrf.mxu0 }
 0x68c   :  { %v700_v48 = vmax.f32 %v699_v46, 0.0 }
 0x68d   :  { %v694_v49 = vpop.f32.mrf.mxu0 }
 0x68e   :  { %702 = vst [vmem:[#allocation12 + $0x38] sm:$0xff] %v700_v48  ;;  %v715_v50 = vpack.c.bf16 %v700_v48, %v653_v31 }
 0x68f   :  { %v1204_v51 = vpop.f32.mrf.mxu0 }
 0x690   :  { %1226 = vmatmul.mubr.bf16.gmra.mxu1 %v715_v50 }
 0x691   :  { %1361 = shalt.err (!%p1358_p10)
}
 0x692   :  { %s1410_s24 = smov 128   ;;  %s1411_s25 = smov 8  }
 0x693   :  { %871 = dma.vmem_to_hbm [thread:$0]  %s866_s22, 1024, %s1707_s6, [#allocation6], %s1410_s24, %s1410_s24, %s1411_s25  }
 0x694   :  { %s1412_s28 = smov [#allocation13]  }
 0x695   :  { %s877_s29 = sshll.u32 %s1412_s28, 4  ;;  %s878_s29 = int_to_ptr.vmem [resolvable:$true] %s877_s29 }
 0x696   :  { %s1370_s30 = scalar_lea.vmem %s878_s29, 1024  ;;  %p1375_p12 = scmp.lt.s32.totalorder %s878_s29, %s878_s29 }
 0x697   :  { %p1371_p11 = scmp.ne.s32.totalorder %s878_s29, %s1370_s30  ;;  %p1376_p13 = scmp.lt.s32.totalorder %s1370_s30, %s1370_s30 }
 0x699   :  { %p1377_p0 = por %p1376_p13, %p1375_p12 }
 0x69b   :  { %p1378_p1 = pnand %p1377_p0, %p1371_p11 }
 0x750   :  { %v1227_v42 = vpop.f32.mrf.mxu1 }
 0x751   :  { %v846_v52 = vadd.f32 %v1227_v42, %v916_v35 }
 0x752   :  { %v837_v53 = vpop.f32.mrf.mxu1 }
 0x753   :  { %858 = vst [vmem:[#allocation13 + $0x30] sm:$0xff] %v846_v52  ;;  %v838_v54 = vadd.f32 %v916_v35, %v837_v53 }
 0x754   :  { %v1228_v55 = vpop.f32.mrf.mxu1 }
 0x755   :  { %856 = vst [vmem:[#allocation13 + $0x20] sm:$0xff] %v838_v54  ;;  %v849_v56 = vadd.f32 %v1228_v55, %v916_v35 }
 0x756   :  { %v840_v57 = vpop.f32.mrf.mxu1 }
 0x757   :  { %859 = vst [vmem:[#allocation13 + $0x38] sm:$0xff] %v849_v56  ;;  %v841_v58 = vadd.f32 %v916_v35, %v840_v57 }
 0x759   :  { %857 = vst [vmem:[#allocation13 + $0x28] sm:$0xff] %v841_v58 }
 0x75a   :  { %1381 = shalt.err (!%p1378_p1)
}
 0x75b   :  { %883 = dma.vmem_to_hbm [thread:$0]  %s878_s29, 1024, %s1708_s7, [#allocation14], %s1410_s24, %s1410_s24, %s1411_s25  }
 0x75c   :  { %1396 = dma.done.wait [#allocation6], 1024  }
 0x75d   :  { %1397 = vsyncadd [#allocation6], 4294966272 }
 0x75e   :  { %1398 = dma.done.wait [#allocation14], 1024  }
 0x75f   :  { %1399 = vsyncadd [#allocation14], 4294966272 }
 0x760   :  { %890 = vsyncpa [#allocation5], 1 }
 0x761   :  { %891 = vsyncpa [#allocation8], 1 }
 0x762   :  { %892 = vsyncpa [#allocation11], 1 }
 0x763   :  { %893 = vsyncpa [#allocation6], 1 }
 0x764   :  { %894 = vsyncpa [#allocation14], 1 }

</bundles_post_ra>
